<compile_context>
chip_gen: v7x
topology: tpu7x:2x2x1
jax: 0.10.0
libtpu: 0.0.40
codegen_flags: <defaults>
</compile_context>

<pallas_src>
import functools

import jax
import jax.numpy as jnp
from jax.experimental import pallas as pl
from jax.experimental.pallas import tpu as pltpu


def _leaf_classifier_kernel(x_ref, w1_ref, b1_ref, w2_ref, b2_ref, o_ref, *, F):
    x = x_ref[...]                                        # (tb, F)

    # feat = leaky_relu(x @ W1 + b1)
    feat = jnp.dot(x, w1_ref[...], preferred_element_type=jnp.float32)
    feat = feat + b1_ref[...]                             # (tb, H)
    feat = jnp.where(feat > 0, feat, 0.01 * feat)         # leaky_relu, slope 0.01

    # out = [x | feat] @ W2 + b2, via static ref slices of the fused weight
    # (W2[:F] == Wskip, W2[F:] == Wmlp2); only one bias add remains.
    out = jnp.dot(x, w2_ref[:F, :], preferred_element_type=jnp.float32)
    out = out + jnp.dot(feat, w2_ref[F:, :], preferred_element_type=jnp.float32)
    out = out + b2_ref[...]                               # (tb, 1)

    o_ref[...] = out.astype(o_ref.dtype)


def leaf_classifier_forward(x, fused_params, *, tile_b=1024):
    """x: (..., F) float32.  fused_params from fuse_params().  Returns (..., 1)."""
    w1 = fused_params["w1"]              # (F, H)
    b1 = fused_params["b1"]              # (1, H)
    w2 = fused_params["w2"]              # (F + H, 1)  = [Wskip ; Wmlp2]
    b2 = fused_params["b2"]              # (1, 1)      = bskip + bmlp2
    F = w1.shape[0]
    H = w1.shape[1]

    lead_shape = x.shape[:-1]
    x2d = x.reshape(-1, F)
    B = x2d.shape[0]

    # Sublane-aligned batch tile; pad B up to a multiple of it.
    tb = max(8, min(int(tile_b), B))
    tb = (tb + 7) // 8 * 8
    n_steps = pl.cdiv(B, tb)
    Bp = n_steps * tb
    xp = x2d if Bp == B else jnp.pad(x2d, ((0, Bp - B), (0, 0)))

    kernel = functools.partial(_leaf_classifier_kernel, F=F)

    out = pl.pallas_call(
        kernel,
        out_shape=jax.ShapeDtypeStruct((Bp, 1), x.dtype),
        grid_spec=pltpu.PrefetchScalarGridSpec(
            num_scalar_prefetch=0,
            grid=(n_steps,),
            in_specs=[
                pl.BlockSpec((tb, F), lambda i: (i, 0)),        # x: tiled over batch
                pl.BlockSpec((F, H), lambda i: (0, 0)),         # W1: VMEM-resident
                pl.BlockSpec((1, H), lambda i: (0, 0)),         # b1
                pl.BlockSpec((F + H, 1), lambda i: (0, 0)),     # fused W2
                pl.BlockSpec((1, 1), lambda i: (0, 0)),         # fused b2
            ],
            out_specs=pl.BlockSpec((tb, 1), lambda i: (i, 0)),
        ),
        compiler_params=pltpu.CompilerParams(
            dimension_semantics=("parallel",)),
    )(xp, w1, b1, w2, b2)

    return out[:B].reshape(*lead_shape, 1)


def init_params(key, feature_size, hidden_size):
    """Synthetic parameters mirroring LeafClassifier.__init__ (weights stored
    transposed relative to torch.nn.Linear: (in, out) instead of (out, in))."""
    ks = jax.random.split(key, 6)
    s = lambda fan_in: 1.0 / jnp.sqrt(jnp.float32(fan_in))

    w_mlp1 = jax.random.normal(ks[0], (feature_size, hidden_size), jnp.float32) * s(feature_size)
    b_mlp1 = jax.random.normal(ks[1], (hidden_size,), jnp.float32) * s(feature_size)
    w_mlp2 = jax.random.normal(ks[2], (hidden_size, 1), jnp.float32) * s(hidden_size)
    b_mlp2 = jax.random.normal(ks[3], (1,), jnp.float32) * s(hidden_size)
    w_skip = jax.random.normal(ks[4], (feature_size, 1), jnp.float32) * s(feature_size)
    b_skip = jax.random.normal(ks[5], (1,), jnp.float32) * s(feature_size)

    return {
        "w_mlp1": w_mlp1, "b_mlp1": b_mlp1,
        "w_mlp2": w_mlp2, "b_mlp2": b_mlp2,
        "w_skip": w_skip, "b_skip": b_skip,
    }


def fuse_params(params):
    """Offline fusion: W2 = [Wskip ; Wmlp2], b2 = bskip + bmlp2; biases pre-reshaped."""
    H = params["w_mlp1"].shape[1]
    w2 = jnp.concatenate([params["w_skip"], params["w_mlp2"]], axis=0)   # (F+H, 1)
    b2 = (params["b_skip"] + params["b_mlp2"]).reshape(1, 1)             # (1, 1)
    return {
        "w1": params["w_mlp1"],
        "b1": params["b_mlp1"].reshape(1, H),
        "w2": w2,
        "b2": b2,
    }


def leaf_classifier_ref(x, params):
    """Pure-JAX reference matching the PyTorch forward."""
    feat = x @ params["w_mlp1"] + params["b_mlp1"]
    feat = jnp.where(feat > 0, feat, 0.01 * feat)
    return (x @ params["w_skip"] + params["b_skip"]
            + feat @ params["w_mlp2"] + params["b_mlp2"])


if __name__ == "__main__":
    feature_size = 32
    hidden_size = 32

    key = jax.random.PRNGKey(0)
    k_param, k_x1, k_x2 = jax.random.split(key, 3)
    params = init_params(k_param, feature_size, hidden_size)
    fused = fuse_params(params)

    # Case 1: small batch, single grid step.
    x_small = jax.random.normal(k_x1, (8, feature_size), jnp.float32)
    out_small = jax.block_until_ready(leaf_classifier_forward(x_small, fused))
    ref_small = leaf_classifier_ref(x_small, params)
    assert out_small.shape == (8, 1)
    assert jnp.allclose(out_small, ref_small, atol=1e-5, rtol=1e-5), "mismatch (small)"

    # Case 2: batch not a multiple of the tile — exercises grid + padding path.
    x_big = jax.random.normal(k_x2, (20, feature_size), jnp.float32)
    out_big = jax.block_until_ready(leaf_classifier_forward(x_big, fused, tile_b=8))
    ref_big = leaf_classifier_ref(x_big, params)
    assert out_big.shape == (20, 1)
    assert jnp.allclose(out_big, ref_big, atol=1e-5, rtol=1e-5), "mismatch (gridded)"

    print("KERNEL_OK")
</pallas_src>

<mosaic_0001>
module attributes {stable_mosaic.version = 11 : i64} {
  func.func @_leaf_classifier_kernel(%arg0: i32, %arg1: memref<8x32xf32, #tpu.memory_space<vmem>>, %arg2: memref<32x32xf32, #tpu.memory_space<vmem>>, %arg3: memref<1x32xf32, #tpu.memory_space<vmem>>, %arg4: memref<64x1xf32, #tpu.memory_space<vmem>>, %arg5: memref<1x1xf32, #tpu.memory_space<vmem>>, %arg6: memref<8x1xf32, #tpu.memory_space<vmem>>) attributes {dimension_semantics = [#tpu.dimension_semantics<parallel>], iteration_bounds = array<i64: 1>, scalar_prefetch = 0 : i64, scratch_operands = 0 : i64, tpu.core_type = #tpu.core_type<tc>, window_params = [{transform_indices = @transform_0, window_bounds = array<i64: 8, 32>}, {pipeline_mode = #tpu.pipeline_mode<synchronous>, transform_indices = @transform_1, window_bounds = array<i64: 32, 32>}, {pipeline_mode = #tpu.pipeline_mode<synchronous>, transform_indices = @transform_2, window_bounds = array<i64: 1, 32>}, {pipeline_mode = #tpu.pipeline_mode<synchronous>, transform_indices = @transform_3, window_bounds = array<i64: 64, 1>}, {pipeline_mode = #tpu.pipeline_mode<synchronous>, transform_indices = @transform_4, window_bounds = array<i64: 1, 1>}, {transform_indices = @transform_5, window_bounds = array<i64: 8, 1>}]} {
    %c0 = arith.constant 0 : index
    %c0_0 = arith.constant 0 : index
    %0 = vector.load %arg1[%c0, %c0_0] : memref<8x32xf32, #tpu.memory_space<vmem>>, vector<8x32xf32>
    %c0_1 = arith.constant 0 : index
    %c0_2 = arith.constant 0 : index
    %1 = vector.load %arg2[%c0_1, %c0_2] : memref<32x32xf32, #tpu.memory_space<vmem>>, vector<32x32xf32>
    %cst = arith.constant dense<0.000000e+00> : vector<8x32xf32>
    %2 = tpu.matmul %0, %1, %cst {dimension_numbers = #tpu.dot_dimension_numbers<[1], [0], [0], [1], [0, 0, 1, 1], [], []>} : vector<8x32xf32>, vector<32x32xf32>, vector<8x32xf32> -> vector<8x32xf32>
    %c0_3 = arith.constant 0 : index
    %c0_4 = arith.constant 0 : index
    %3 = vector.load %arg3[%c0_3, %c0_4] : memref<1x32xf32, #tpu.memory_space<vmem>>, vector<1x32xf32>
    %4 = vector.broadcast %3 : vector<1x32xf32> to vector<8x32xf32>
    %5 = arith.addf %2, %4 : vector<8x32xf32>
    %cst_5 = arith.constant 0.000000e+00 : f32
    %6 = vector.broadcast %cst_5 : f32 to vector<8x32xf32>
    %7 = arith.cmpf ogt, %5, %6 : vector<8x32xf32>
    %cst_6 = arith.constant 0.00999999977 : f32
    %8 = vector.broadcast %cst_6 : f32 to vector<8x32xf32>
    %9 = arith.mulf %8, %5 : vector<8x32xf32>
    %10 = arith.select %7, %5, %9 : vector<8x32xi1>, vector<8x32xf32>
    %c0_7 = arith.constant 0 : index
    %c0_8 = arith.constant 0 : index
    %11 = vector.load %arg4[%c0_7, %c0_8] : memref<64x1xf32, #tpu.memory_space<vmem>>, vector<32x1xf32>
    %cst_9 = arith.constant dense<0.000000e+00> : vector<8x1xf32>
    %12 = tpu.matmul %0, %11, %cst_9 {dimension_numbers = #tpu.dot_dimension_numbers<[1], [0], [0], [1], [0, 0, 1, 1], [], []>} : vector<8x32xf32>, vector<32x1xf32>, vector<8x1xf32> -> vector<8x1xf32>
    %c32 = arith.constant 32 : index
    %c0_10 = arith.constant 0 : index
    %13 = vector.load %arg4[%c32, %c0_10] : memref<64x1xf32, #tpu.memory_space<vmem>>, vector<32x1xf32>
    %cst_11 = arith.constant dense<0.000000e+00> : vector<8x1xf32>
    %14 = tpu.matmul %10, %13, %cst_11 {dimension_numbers = #tpu.dot_dimension_numbers<[1], [0], [0], [1], [0, 0, 1, 1], [], []>} : vector<8x32xf32>, vector<32x1xf32>, vector<8x1xf32> -> vector<8x1xf32>
    %15 = arith.addf %12, %14 : vector<8x1xf32>
    %c0_12 = arith.constant 0 : index
    %c0_13 = arith.constant 0 : index
    %16 = vector.load %arg5[%c0_12, %c0_13] : memref<1x1xf32, #tpu.memory_space<vmem>>, vector<1x1xf32>
    %17 = vector.broadcast %16 : vector<1x1xf32> to vector<8x1xf32>
    %18 = arith.addf %15, %17 : vector<8x1xf32>
    %c0_14 = arith.constant 0 : index
    %c0_15 = arith.constant 0 : index
    %19 = vector.load %arg6[%c0_14, %c0_15] : memref<8x1xf32, #tpu.memory_space<vmem>>, vector<8x1xf32>
    tpu.vector_store %arg6[%c0_14, %c0_15], %18 {strides = array<i32>} : memref<8x1xf32, #tpu.memory_space<vmem>>, vector<8x1xf32>,
    return
  }
  func.func @transform_0(%arg0: i32) -> (i32, i32) {
    %c0_i32 = arith.constant 0 : i32
    %c0_i32_0 = arith.constant 0 : i32
    return %arg0, %c0_i32 : i32, i32
  }
  func.func @transform_1(%arg0: i32) -> (i32, i32) {
    %c0_i32 = arith.constant 0 : i32
    %c0_i32_0 = arith.constant 0 : i32
    %c0_i32_1 = arith.constant 0 : i32
    return %c0_i32, %c0_i32_0 : i32, i32
  }
  func.func @transform_2(%arg0: i32) -> (i32, i32) {
    %c0_i32 = arith.constant 0 : i32
    %c0_i32_0 = arith.constant 0 : i32
    %c0_i32_1 = arith.constant 0 : i32
    return %c0_i32, %c0_i32_0 : i32, i32
  }
  func.func @transform_3(%arg0: i32) -> (i32, i32) {
    %c0_i32 = arith.constant 0 : i32
    %c0_i32_0 = arith.constant 0 : i32
    %c0_i32_1 = arith.constant 0 : i32
    return %c0_i32, %c0_i32_0 : i32, i32
  }
  func.func @transform_4(%arg0: i32) -> (i32, i32) {
    %c0_i32 = arith.constant 0 : i32
    %c0_i32_0 = arith.constant 0 : i32
    %c0_i32_1 = arith.constant 0 : i32
    return %c0_i32, %c0_i32_0 : i32, i32
  }
  func.func @transform_5(%arg0: i32) -> (i32, i32) {
    %c0_i32 = arith.constant 0 : i32
    %c0_i32_0 = arith.constant 0 : i32
    return %arg0, %c0_i32 : i32, i32
  }
}

</mosaic_0001>

<bundles_post_ra>
// kernel: tpu_custom_call.1
= control target key start
LH: loop header
LB: loop body
LE: loop exit
PB: predicated region body
PF: predicated region fallthrough
CT: control target
= control target key end

     0   :  { %v350_v0 = vmov 0.0|0.0   ;;  %vm351_vm0 = vmmov 0   ;;  %v352_v4 = vmov 0.0   ;;  %vm34_vm1 = vcmask 261120   ;;  %s437_s1 = inlined_call_operand.vmem [shape: f32[32,32], index: 1, kind: input, shape index: {}]   ;;  %s438_s3 = inlined_call_operand.vmem [shape: f32[64,1], index: 3, kind: input, shape index: {}]   ;;  %s439_s0 = inlined_call_operand.vmem [shape: f32[8,32], index: 0, kind: input, shape index: {}]   ;;  %s440_s4 = inlined_call_operand.<no memory space> [shape: f32[1,1], index: 4, kind: input, shape index: {}]   ;;  %s441_s2 = inlined_call_operand.vmem [shape: f32[1,32], index: 2, kind: input, shape index: {}]   ;;  %s442_s5 = inlined_call_operand.vmem [shape: f32[8,1], index: 5, kind: output, shape index: {}]  }
   0x1   :  { %329 = vmatprep.subr.bf16.mxu0 %v350_v0  ;;  %v23_v1 = vld [vmem:[%s437_s1] sm:$0xff]  ;;  %v24_v2 = vld [vmem:[%s437_s1 + $0x8] sm:$0xff]  ;;  %v25_v3 = vld [vmem:[%s437_s1 + $0x10] sm:$0xff]  ;;  %304 = vmatprep.mubr.msk.f32.mxu0 %vm351_vm0, %v352_v4  ;;  %v10_v21 = vstv %s440_s4  ;;  %vm270_vm3 = vcmask 7168  }
   0x2   :  { %v330_v5 = vpack.c.bf16 %v24_v2, %v23_v1  ;;  %v26_v6 = vld [vmem:[%s437_s1 + $0x18] sm:$0xff]  ;;  %335 = vmatprep.subr.bf16.mxu1 %v350_v0  ;;  %315 = vmatprep.mubr.msk.f32.mxu1 %vm351_vm0, %v352_v4  ;;  %v115_v7 = vld [vmem:[%s438_s3 + $0x20] sm:$0xff]  ;;  %v116_v8 = vld [vmem:[%s438_s3 + $0x28] sm:$0xff]  ;;  %11 = vst [vmem:[#allocation2] sm:$0x1] %v10_v21 }
   0x3   :  { %v333_v9 = vpack.c.bf16 %v26_v6, %v25_v3  ;;  %v336_v10 = vpack.c.bf16 %v116_v8, %v115_v7  ;;  %v111_v11 = vld [vmem:[%s438_s3] sm:$0xff]  ;;  %v112_v12 = vld [vmem:[%s438_s3 + $0x8] sm:$0xff]  ;;  %v113_v15 = vld [vmem:[%s438_s3 + $0x10] sm:$0xff] }
   0x4   :  { %331 = vmatpush3.bf16.msra.mxu0 %v330_v5  ;;  %v22_v13 = vld [vmem:[%s439_s0] sm:$0xff]  ;;  %v342_v14 = vpack.c.bf16 %v112_v12, %v111_v11  ;;  %v114_v16 = vld [vmem:[%s438_s3 + $0x18] sm:$0xff]  ;;  %v117_v18 = vld [vmem:[%s438_s3 + $0x30] sm:$0xff] }
   0x5   :  { %332 = vmatprep.subr.bf16.mxu0 %v350_v0  ;;  %337 = vmatpush3.bf16.msra.mxu1 %v336_v10  ;;  %v345_v17 = vpack.c.bf16 %v114_v16, %v113_v15  ;;  %v118_v19 = vld [vmem:[%s438_s3 + $0x38] sm:$0xff]  ;;  %v276_v22 = vld [vmem:[%s441_s2] ss:$0 sm:$0xff] }
   0x6   :  { %338 = vmatprep.subr.bf16.mxu1 %v350_v0  ;;  %v339_v20 = vpack.c.bf16 %v118_v19, %v117_v18 }
   0x8   :  { %334 = vmatpush3.bf16.msra.mxu0 %v333_v9 }
   0x9   :  { %341 = vmatprep.subr.bf16.mxu0 %v350_v0  ;;  %340 = vmatpush3.bf16.msra.mxu1 %v339_v20  ;;  %v280_v31 = vld [vmem:[#allocation2] ss:$0 sm:$0xff] }
   0xb   :  { %305 = vmatmul.mubr.msk.f32.vlgmr.msra.gmra.mrb[0].mxu0 %vm34_vm1, %v22_v13 }
   0xc   :  { %343 = vmatpush3.bf16.msra.mxu0 %v342_v14  ;;  %326 = vmatprep.mubr.msk.f32.mxu0 %vm351_vm0, %v352_v4 }
   0xd   :  { %344 = vmatprep.subr.bf16.mxu0 %v350_v0 }
  0x10   :  { %346 = vmatpush3.bf16.msra.mxu0 %v345_v17 }
  0x13   :  { %327 = vmatmul.mubr.msk.f32.vlgmr.msra.gmra.mrb[2].mxu0 %vm34_vm1, %v22_v13 }
  0xde   :  { %v104_v23 = vpop.f32.mrb[0].mxu0 }
  0xdf   :  { %v105_v24 = vadd.f32 %v276_v22, %v104_v23  ;;  %v306_v25 = vpop.f32.mrb[1].mxu0 }
  0xe1   :  { %vm108_vm2 = vcmp.gt.f32.partialorder %v105_v24, 0.0  ;;  %v109_v26 = vmul.f32 0.01, %v105_v24 }
  0xe3   :  { %v110_v27 = vsel %vm108_vm2, %v105_v24, %v109_v26 }
  0xe4   :  { %316 = vmatmul.mubr.msk.f32.vlgmr.msra.gmra.mrb[0].mxu1 %vm34_vm1, %v110_v27 }
  0xe6   :  { %v258_v28 = vpop.f32.mrb[2].mxu0 }
  0xe7   :  { %v328_v29 = vpop.f32.mrb[3].mxu0 }
 0x1b7   :  { %v188_v30 = vpop.f32.mrb[0].mxu1 }
 0x1b8   :  { %v259_v32 = vadd.f32 %v258_v28, %v188_v30  ;;  %v317_v33 = vpop.f32.mrb[1].mxu1 }
 0x1ba   :  { %v269_v34 = vadd.f32 %v280_v31, %v259_v32 }
 0x1bc   :  { %271 = vst.msk [vmem:[%s442_s5] sm:$0xff] %vm270_vm3, %v269_v34 }

</bundles_post_ra>
